<compile_context>
chip_gen: v6e
topology: v6e:2x2x1
jax: 0.10.0
libtpu: 0.0.40
codegen_flags: <defaults>
</compile_context>

<pallas_src>
import functools

import jax
import jax.numpy as jnp
from jax.experimental import pallas as pl
from jax.experimental.pallas import tpu as pltpu


def memnn_kernel(x_ref, qbow_ref, mcat_ref, mlast_t_ref, pe_rows_ref, s_ref,
                 e_ref, et_ref, ta_ref, tc_ref, out_ref,
                 *, TB, L, J, D, V, V_pad, hops):
    R = TB * L * J                                                    # one-hot rows per step

    mcat = mcat_ref[...]                                              # (V_pad, C)

    # ---- story embeddings: one lane-dense MXU dot for the whole batch tile & all tables ----
    iota = jax.lax.broadcasted_iota(jnp.int32, (R, V_pad), 1)
    onehot = (iota == x_ref[...]).astype(jnp.float32)                 # (R, V_pad)
    emb_all = jnp.dot(onehot, mcat,
                      preferred_element_type=jnp.float32)             # (R, C)

    # J-sum (and pe-weighted J-sum) via the block-diagonal reduction matmul.
    s = s_ref[...]                                                    # (TB*L, R)
    in_all = jnp.dot(s, emb_all * pe_rows_ref[...],
                     preferred_element_type=jnp.float32)              # (TB*L, C)
    out_all = jnp.dot(s, emb_all,
                      preferred_element_type=jnp.float32)             # (TB*L, C)

    ta = ta_ref[...]                                                  # (TB*L, D)
    tc = tc_ref[...]                                                  # (TB*L, D)

    # ---- question embedding: bag-of-words (from wrapper) @ M[0] columns of the fused table ----
    query = jnp.dot(qbow_ref[...], mcat[:, :D],
                    preferred_element_type=jnp.float32)               # (TB, D)

    e = e_ref[...]                                                    # (TB*L, TB) batch expansion
    et = et_ref[...]                                                  # (TB, TB*L) segment sum

    # TODO(synk): nn.Dropout has no deterministic Pallas equivalent; identity (eval mode).
    for i in range(hops):
        in_mem = in_all[:, i * D:(i + 1) * D] + ta                    # (TB*L, D)  M[i], pe-weighted
        out_mem = out_all[:, (i + 1) * D:(i + 2) * D] + tc            # (TB*L, D)  M[i+1]

        query_rows = jnp.dot(e, query,
                             preferred_element_type=jnp.float32)      # (TB*L, D)
        attn = jnp.sum(in_mem * query_rows, axis=1, keepdims=True)    # (TB*L, 1)

        # Softmax over the story length within each batch element; a single tile-global
        # shift is exact (per-batch shift invariance) and numerically safe here.
        p = jnp.exp(attn - jnp.max(attn, axis=0, keepdims=True))      # (TB*L, 1)
        num = jnp.dot(et, p * out_mem,
                      preferred_element_type=jnp.float32)             # (TB, D)
        den = jnp.dot(et, p,
                      preferred_element_type=jnp.float32)             # (TB, 1)
        query = num / den + query                                     # (TB, D)

    # ---- final projection against the pre-transposed (D, V_pad) table, then log_softmax ----
    logits = jnp.dot(query, mlast_t_ref[...],
                     preferred_element_type=jnp.float32)              # (TB, V_pad)
    if V_pad > V:
        col = jax.lax.broadcasted_iota(jnp.int32, (TB, V_pad), 1)
        logits = jnp.where(col < V, logits, -1e30)                    # mask padded vocab lanes

    m = jnp.max(logits, axis=1, keepdims=True)
    shifted = logits - m
    lse = jnp.log(jnp.sum(jnp.exp(shifted), axis=1, keepdims=True))
    out_ref[...] = shifted - lse


def position_encoding(J, D):
    # l_kj = 1 - j/J - (k/d) * (1 - 2j/J), 1-indexed j, k (matches the PyTorch loops).
    j = jnp.arange(1, J + 1, dtype=jnp.float32)[:, None]
    k = jnp.arange(1, D + 1, dtype=jnp.float32)[None, :]
    return 1.0 - j / J - (k / D) * (1.0 - 2.0 * j / J)


def _pick_batch_tile(B):
    # Whole batch per step for small B (amortizes per-step grid overhead); for larger
    # batches pick a sublane-friendly divisor so the grid has several "parallel" steps
    # (v7x megacore) while each MXU dot keeps hundreds of LHS rows.
    if B <= 8:
        return B
    for tb in (32, 16, 8):
        if B % tb == 0:
            return tb
    return B


def memnn_forward(x, question, M, TA, TC, pe, hops):
    B, L, J = x.shape
    _, V, D = M.shape
    LJ = L * J
    C = (hops + 1) * D
    V_pad = max(128, ((V + 127) // 128) * 128)

    TB = _pick_batch_tile(B)
    G = B // TB
    R = TB * LJ

    # Story token ids, flattened row-major so a batch tile is a contiguous row block.
    x_flat = x.reshape(B * LJ, 1).astype(jnp.int32)

    # Question bag-of-words counts, hoisted out of the kernel (exact integral LHS).
    qbow = jnp.sum(jax.nn.one_hot(question, V_pad, dtype=jnp.float32), axis=1)    # (B, V_pad)

    # Fused, lane-dense embedding table: all hops+1 tables concatenated along D, V padded to 128.
    m_cat = jnp.concatenate([M[i] for i in range(hops + 1)], axis=1)              # (V, C)
    m_cat = jnp.pad(m_cat, ((0, V_pad - V), (0, 0)))                              # (V_pad, C)
    m_last_t = jnp.pad(jnp.transpose(M[hops]), ((0, 0), (0, V_pad - V)))          # (D, V_pad)

    # Per-row position encoding (row r uses pe[r % J]), tiled across hop tables & batch tile.
    pe_rows = jnp.tile(jnp.tile(pe, (1, hops + 1)), (TB * L, 1))                  # (R, C)

    # Grid-invariant block-diagonal J-sum matrix: S[b*L + l, b*LJ + n] = 1 iff n // J == l.
    rows = jnp.arange(TB * L)
    cols = jnp.arange(R)
    s = ((rows[:, None] // L == cols[None, :] // LJ) &
         (rows[:, None] % L == (cols[None, :] % LJ) // J)).astype(jnp.float32)    # (TB*L, R)

    # Batch expansion / per-batch segment-sum matrices for the batched hop loop.
    e = (rows[:, None] // L == jnp.arange(TB)[None, :]).astype(jnp.float32)       # (TB*L, TB)
    et = jnp.transpose(e)                                                         # (TB, TB*L)

    ta_rows = jnp.tile(TA[0, :L, :], (TB, 1))                                     # (TB*L, D)
    tc_rows = jnp.tile(TC[0, :L, :], (TB, 1))                                     # (TB*L, D)

    kernel = functools.partial(memnn_kernel,
                               TB=TB, L=L, J=J, D=D, V=V, V_pad=V_pad, hops=hops)

    out = pl.pallas_call(
        kernel,
        grid=(G,),
        out_shape=jax.ShapeDtypeStruct((B, V_pad), jnp.float32),
        in_specs=[
            pl.BlockSpec((R, 1), lambda g: (g, 0)),          # story token ids (batch tile)
            pl.BlockSpec((TB, V_pad), lambda g: (g, 0)),     # question bag-of-words
            pl.BlockSpec((V_pad, C), lambda g: (0, 0)),      # fused embedding tables
            pl.BlockSpec((D, V_pad), lambda g: (0, 0)),      # pre-transposed final table
            pl.BlockSpec((R, C), lambda g: (0, 0)),          # position-encoding rows
            pl.BlockSpec((TB * L, R), lambda g: (0, 0)),     # block-diagonal J-sum matrix
            pl.BlockSpec((TB * L, TB), lambda g: (0, 0)),    # batch expansion E
            pl.BlockSpec((TB, TB * L), lambda g: (0, 0)),    # segment-sum E^T
            pl.BlockSpec((TB * L, D), lambda g: (0, 0)),     # TA rows
            pl.BlockSpec((TB * L, D), lambda g: (0, 0)),     # TC rows
        ],
        out_specs=pl.BlockSpec((TB, V_pad), lambda g: (g, 0)),
        compiler_params=pltpu.CompilerParams(dimension_semantics=("parallel",)),
    )(x_flat, qbow, m_cat, m_last_t, pe_rows, s, e, et, ta_rows, tc_rows)

    return out[:, :V]


def memnn_ref(x, question, M, TA, TC, pe, hops):
    # Pure-JAX reference mirroring the PyTorch forward (dropout = identity).
    B, L, J = x.shape
    query = jnp.sum(M[0][question], axis=1)
    x2 = x.reshape(B * L, J)
    for i in range(hops):
        in_mem = (M[i][x2].reshape(B, L, J, -1) * pe).sum(2) + TA[:, :L, :]
        out_mem = M[i + 1][x2].reshape(B, L, J, -1).sum(2) + TC[:, :L, :]
        attn = jnp.einsum('bld,bd->bl', in_mem, query)
        probs = jax.nn.softmax(attn, -1)
        mem_out = jnp.einsum('bl,bld->bd', probs, out_mem)
        query = mem_out + query
    out = query @ M[hops].T
    return jax.nn.log_softmax(out, -1)


if __name__ == "__main__":
    vocab_size, embd_size, hops = 32, 32, 3
    max_story_len = 10
    B, L, J, Q = 2, 8, 6, 5   # batch, story_len, story_sent_len, question_len

    key = jax.random.PRNGKey(0)
    k1, k2, k3, k4, k5 = jax.random.split(key, 5)

    # Deterministic parameter init (normal(0, 0.1), embedding row 0 zeroed like the module).
    M = 0.1 * jax.random.normal(k1, (hops + 1, vocab_size, embd_size), jnp.float32)
    M = M.at[:, 0, :].set(0.0)
    TA = 0.1 * jax.random.normal(k2, (1, max_story_len, embd_size), jnp.float32)
    TC = 0.1 * jax.random.normal(k3, (1, max_story_len, embd_size), jnp.float32)

    x = jax.random.randint(k4, (B, L, J), 0, vocab_size, jnp.int32)
    question = jax.random.randint(k5, (B, Q), 0, vocab_size, jnp.int32)
    pe = position_encoding(J, embd_size)

    out = memnn_forward(x, question, M, TA, TC, pe, hops)
    out = jax.block_until_ready(out)

    ref = memnn_ref(x, question, M, TA, TC, pe, hops)
    assert out.shape == (B, vocab_size)
    assert jnp.allclose(out, ref, atol=1e-4, rtol=1e-4), float(jnp.max(jnp.abs(out - ref)))
    print("KERNEL_OK")
</pallas_src>

<mosaic_0001>
module attributes {stable_mosaic.version = 11 : i64} {
  func.func @memnn_kernel(%arg0: i32, %arg1: memref<96x1xi32, #tpu.memory_space<vmem>>, %arg2: memref<2x128xf32, #tpu.memory_space<vmem>>, %arg3: memref<128x128xf32, #tpu.memory_space<vmem>>, %arg4: memref<32x128xf32, #tpu.memory_space<vmem>>, %arg5: memref<96x128xf32, #tpu.memory_space<vmem>>, %arg6: memref<16x96xf32, #tpu.memory_space<vmem>>, %arg7: memref<16x2xf32, #tpu.memory_space<vmem>>, %arg8: memref<2x16xf32, #tpu.memory_space<vmem>>, %arg9: memref<16x32xf32, #tpu.memory_space<vmem>>, %arg10: memref<16x32xf32, #tpu.memory_space<vmem>>, %arg11: memref<2x128xf32, #tpu.memory_space<vmem>>) attributes {dimension_semantics = [#tpu.dimension_semantics<parallel>], iteration_bounds = array<i64: 1>, scalar_prefetch = 0 : i64, scratch_operands = 0 : i64, tpu.core_type = #tpu.core_type<tc>, window_params = [{transform_indices = @transform_0, window_bounds = array<i64: 96, 1>}, {transform_indices = @transform_1, window_bounds = array<i64: 2, 128>}, {pipeline_mode = #tpu.pipeline_mode<synchronous>, transform_indices = @transform_2, window_bounds = array<i64: 128, 128>}, {pipeline_mode = #tpu.pipeline_mode<synchronous>, transform_indices = @transform_3, window_bounds = array<i64: 32, 128>}, {pipeline_mode = #tpu.pipeline_mode<synchronous>, transform_indices = @transform_4, window_bounds = array<i64: 96, 128>}, {pipeline_mode = #tpu.pipeline_mode<synchronous>, transform_indices = @transform_5, window_bounds = array<i64: 16, 96>}, {pipeline_mode = #tpu.pipeline_mode<synchronous>, transform_indices = @transform_6, window_bounds = array<i64: 16, 2>}, {pipeline_mode = #tpu.pipeline_mode<synchronous>, transform_indices = @transform_7, window_bounds = array<i64: 2, 16>}, {pipeline_mode = #tpu.pipeline_mode<synchronous>, transform_indices = @transform_8, window_bounds = array<i64: 16, 32>}, {pipeline_mode = #tpu.pipeline_mode<synchronous>, transform_indices = @transform_9, window_bounds = array<i64: 16, 32>}, {transform_indices = @transform_10, window_bounds = array<i64: 2, 128>}]} {
    %c0 = arith.constant 0 : index
    %c0_0 = arith.constant 0 : index
    %0 = vector.load %arg3[%c0, %c0_0] : memref<128x128xf32, #tpu.memory_space<vmem>>, vector<128x128xf32>
    %1 = tpu.iota {dimensions = array<i32: 1>} : vector<96x128xi32>
    %c0_1 = arith.constant 0 : index
    %c0_2 = arith.constant 0 : index
    %2 = vector.load %arg1[%c0_1, %c0_2] : memref<96x1xi32, #tpu.memory_space<vmem>>, vector<96x1xi32>
    %3 = vector.broadcast %2 : vector<96x1xi32> to vector<96x128xi32>
    %4 = arith.cmpi eq, %1, %3 : vector<96x128xi32>
    %5 = arith.extui %4 : vector<96x128xi1> to vector<96x128xi32>
    %6 = arith.sitofp %5 : vector<96x128xi32> to vector<96x128xf32>
    %cst = arith.constant dense<0.000000e+00> : vector<96x128xf32>
    %7 = tpu.matmul %6, %0, %cst {dimension_numbers = #tpu.dot_dimension_numbers<[1], [0], [0], [1], [0, 0, 1, 1], [], []>} : vector<96x128xf32>, vector<128x128xf32>, vector<96x128xf32> -> vector<96x128xf32>
    %c0_3 = arith.constant 0 : index
    %c0_4 = arith.constant 0 : index
    %8 = vector.load %arg6[%c0_3, %c0_4] : memref<16x96xf32, #tpu.memory_space<vmem>>, vector<16x96xf32>
    %c0_5 = arith.constant 0 : index
    %c0_6 = arith.constant 0 : index
    %9 = vector.load %arg5[%c0_5, %c0_6] : memref<96x128xf32, #tpu.memory_space<vmem>>, vector<96x128xf32>
    %10 = arith.mulf %7, %9 : vector<96x128xf32>
    %cst_7 = arith.constant dense<0.000000e+00> : vector<16x128xf32>
    %11 = tpu.matmul %8, %10, %cst_7 {dimension_numbers = #tpu.dot_dimension_numbers<[1], [0], [0], [1], [0, 0, 1, 1], [], []>} : vector<16x96xf32>, vector<96x128xf32>, vector<16x128xf32> -> vector<16x128xf32>
    %cst_8 = arith.constant dense<0.000000e+00> : vector<16x128xf32>
    %12 = tpu.matmul %8, %7, %cst_8 {dimension_numbers = #tpu.dot_dimension_numbers<[1], [0], [0], [1], [0, 0, 1, 1], [], []>} : vector<16x96xf32>, vector<96x128xf32>, vector<16x128xf32> -> vector<16x128xf32>
    %c0_9 = arith.constant 0 : index
    %c0_10 = arith.constant 0 : index
    %13 = vector.load %arg9[%c0_9, %c0_10] : memref<16x32xf32, #tpu.memory_space<vmem>>, vector<16x32xf32>
    %c0_11 = arith.constant 0 : index
    %c0_12 = arith.constant 0 : index
    %14 = vector.load %arg10[%c0_11, %c0_12] : memref<16x32xf32, #tpu.memory_space<vmem>>, vector<16x32xf32>
    %c0_13 = arith.constant 0 : index
    %c0_14 = arith.constant 0 : index
    %15 = vector.load %arg2[%c0_13, %c0_14] : memref<2x128xf32, #tpu.memory_space<vmem>>, vector<2x128xf32>
    %16 = vector.extract_strided_slice %0 {offsets = [0, 0], sizes = [128, 32], strides = [1, 1]} : vector<128x128xf32> to vector<128x32xf32>
    %cst_15 = arith.constant dense<0.000000e+00> : vector<2x32xf32>
    %17 = tpu.matmul %15, %16, %cst_15 {dimension_numbers = #tpu.dot_dimension_numbers<[1], [0], [0], [1], [0, 0, 1, 1], [], []>} : vector<2x128xf32>, vector<128x32xf32>, vector<2x32xf32> -> vector<2x32xf32>
    %c0_16 = arith.constant 0 : index
    %c0_17 = arith.constant 0 : index
    %18 = vector.load %arg7[%c0_16, %c0_17] : memref<16x2xf32, #tpu.memory_space<vmem>>, vector<16x2xf32>
    %c0_18 = arith.constant 0 : index
    %c0_19 = arith.constant 0 : index
    %19 = vector.load %arg8[%c0_18, %c0_19] : memref<2x16xf32, #tpu.memory_space<vmem>>, vector<2x16xf32>
    %20 = vector.extract_strided_slice %11 {offsets = [0, 0], sizes = [16, 32], strides = [1, 1]} : vector<16x128xf32> to vector<16x32xf32>
    %21 = arith.addf %20, %13 : vector<16x32xf32>
    %22 = vector.extract_strided_slice %12 {offsets = [0, 32], sizes = [16, 32], strides = [1, 1]} : vector<16x128xf32> to vector<16x32xf32>
    %23 = arith.addf %22, %14 : vector<16x32xf32>
    %cst_20 = arith.constant dense<0.000000e+00> : vector<16x32xf32>
    %24 = tpu.matmul %18, %17, %cst_20 {dimension_numbers = #tpu.dot_dimension_numbers<[1], [0], [0], [1], [0, 0, 1, 1], [], []>} : vector<16x2xf32>, vector<2x32xf32>, vector<16x32xf32> -> vector<16x32xf32>
    %25 = arith.mulf %21, %24 : vector<16x32xf32>
    %cst_21 = arith.constant dense<0.000000e+00> : vector<16xf32>
    %26 = vector.multi_reduction <add>, %25, %cst_21 [1] : vector<16x32xf32> to vector<16xf32>
    %27 = vector.shape_cast %26 : vector<16xf32> to vector<16x1xf32>
    %cst_22 = arith.constant dense<0xFF800000> : vector<1xf32>
    %28 = vector.multi_reduction <maximumf>, %27, %cst_22 [0] : vector<16x1xf32> to vector<1xf32>
    %29 = vector.shape_cast %28 : vector<1xf32> to vector<1x1xf32>
    %30 = vector.broadcast %29 : vector<1x1xf32> to vector<16x1xf32>
    %31 = arith.subf %27, %30 : vector<16x1xf32>
    %32 = math.exp %31 : vector<16x1xf32>
    %33 = vector.broadcast %32 : vector<16x1xf32> to vector<16x32xf32>
    %34 = arith.mulf %33, %23 : vector<16x32xf32>
    %cst_23 = arith.constant dense<0.000000e+00> : vector<2x32xf32>
    %35 = tpu.matmul %19, %34, %cst_23 {dimension_numbers = #tpu.dot_dimension_numbers<[1], [0], [0], [1], [0, 0, 1, 1], [], []>} : vector<2x16xf32>, vector<16x32xf32>, vector<2x32xf32> -> vector<2x32xf32>
    %cst_24 = arith.constant dense<0.000000e+00> : vector<2x1xf32>
    %36 = tpu.matmul %19, %32, %cst_24 {dimension_numbers = #tpu.dot_dimension_numbers<[1], [0], [0], [1], [0, 0, 1, 1], [], []>} : vector<2x16xf32>, vector<16x1xf32>, vector<2x1xf32> -> vector<2x1xf32>
    %37 = vector.broadcast %36 : vector<2x1xf32> to vector<2x32xf32>
    %38 = arith.divf %35, %37 : vector<2x32xf32>
    %39 = arith.addf %38, %17 : vector<2x32xf32>
    %40 = vector.extract_strided_slice %11 {offsets = [0, 32], sizes = [16, 32], strides = [1, 1]} : vector<16x128xf32> to vector<16x32xf32>
    %41 = arith.addf %40, %13 : vector<16x32xf32>
    %42 = vector.extract_strided_slice %12 {offsets = [0, 64], sizes = [16, 32], strides = [1, 1]} : vector<16x128xf32> to vector<16x32xf32>
    %43 = arith.addf %42, %14 : vector<16x32xf32>
    %cst_25 = arith.constant dense<0.000000e+00> : vector<16x32xf32>
    %44 = tpu.matmul %18, %39, %cst_25 {dimension_numbers = #tpu.dot_dimension_numbers<[1], [0], [0], [1], [0, 0, 1, 1], [], []>} : vector<16x2xf32>, vector<2x32xf32>, vector<16x32xf32> -> vector<16x32xf32>
    %45 = arith.mulf %41, %44 : vector<16x32xf32>
    %cst_26 = arith.constant dense<0.000000e+00> : vector<16xf32>
    %46 = vector.multi_reduction <add>, %45, %cst_26 [1] : vector<16x32xf32> to vector<16xf32>
    %47 = vector.shape_cast %46 : vector<16xf32> to vector<16x1xf32>
    %cst_27 = arith.constant dense<0xFF800000> : vector<1xf32>
    %48 = vector.multi_reduction <maximumf>, %47, %cst_27 [0] : vector<16x1xf32> to vector<1xf32>
    %49 = vector.shape_cast %48 : vector<1xf32> to vector<1x1xf32>
    %50 = vector.broadcast %49 : vector<1x1xf32> to vector<16x1xf32>
    %51 = arith.subf %47, %50 : vector<16x1xf32>
    %52 = math.exp %51 : vector<16x1xf32>
    %53 = vector.broadcast %52 : vector<16x1xf32> to vector<16x32xf32>
    %54 = arith.mulf %53, %43 : vector<16x32xf32>
    %cst_28 = arith.constant dense<0.000000e+00> : vector<2x32xf32>
    %55 = tpu.matmul %19, %54, %cst_28 {dimension_numbers = #tpu.dot_dimension_numbers<[1], [0], [0], [1], [0, 0, 1, 1], [], []>} : vector<2x16xf32>, vector<16x32xf32>, vector<2x32xf32> -> vector<2x32xf32>
    %cst_29 = arith.constant dense<0.000000e+00> : vector<2x1xf32>
    %56 = tpu.matmul %19, %52, %cst_29 {dimension_numbers = #tpu.dot_dimension_numbers<[1], [0], [0], [1], [0, 0, 1, 1], [], []>} : vector<2x16xf32>, vector<16x1xf32>, vector<2x1xf32> -> vector<2x1xf32>
    %57 = vector.broadcast %56 : vector<2x1xf32> to vector<2x32xf32>
    %58 = arith.divf %55, %57 : vector<2x32xf32>
    %59 = arith.addf %58, %39 : vector<2x32xf32>
    %60 = vector.extract_strided_slice %11 {offsets = [0, 64], sizes = [16, 32], strides = [1, 1]} : vector<16x128xf32> to vector<16x32xf32>
    %61 = arith.addf %60, %13 : vector<16x32xf32>
    %62 = vector.extract_strided_slice %12 {offsets = [0, 96], sizes = [16, 32], strides = [1, 1]} : vector<16x128xf32> to vector<16x32xf32>
    %63 = arith.addf %62, %14 : vector<16x32xf32>
    %cst_30 = arith.constant dense<0.000000e+00> : vector<16x32xf32>
    %64 = tpu.matmul %18, %59, %cst_30 {dimension_numbers = #tpu.dot_dimension_numbers<[1], [0], [0], [1], [0, 0, 1, 1], [], []>} : vector<16x2xf32>, vector<2x32xf32>, vector<16x32xf32> -> vector<16x32xf32>
    %65 = arith.mulf %61, %64 : vector<16x32xf32>
    %cst_31 = arith.constant dense<0.000000e+00> : vector<16xf32>
    %66 = vector.multi_reduction <add>, %65, %cst_31 [1] : vector<16x32xf32> to vector<16xf32>
    %67 = vector.shape_cast %66 : vector<16xf32> to vector<16x1xf32>
    %cst_32 = arith.constant dense<0xFF800000> : vector<1xf32>
    %68 = vector.multi_reduction <maximumf>, %67, %cst_32 [0] : vector<16x1xf32> to vector<1xf32>
    %69 = vector.shape_cast %68 : vector<1xf32> to vector<1x1xf32>
    %70 = vector.broadcast %69 : vector<1x1xf32> to vector<16x1xf32>
    %71 = arith.subf %67, %70 : vector<16x1xf32>
    %72 = math.exp %71 : vector<16x1xf32>
    %73 = vector.broadcast %72 : vector<16x1xf32> to vector<16x32xf32>
    %74 = arith.mulf %73, %63 : vector<16x32xf32>
    %cst_33 = arith.constant dense<0.000000e+00> : vector<2x32xf32>
    %75 = tpu.matmul %19, %74, %cst_33 {dimension_numbers = #tpu.dot_dimension_numbers<[1], [0], [0], [1], [0, 0, 1, 1], [], []>} : vector<2x16xf32>, vector<16x32xf32>, vector<2x32xf32> -> vector<2x32xf32>
    %cst_34 = arith.constant dense<0.000000e+00> : vector<2x1xf32>
    %76 = tpu.matmul %19, %72, %cst_34 {dimension_numbers = #tpu.dot_dimension_numbers<[1], [0], [0], [1], [0, 0, 1, 1], [], []>} : vector<2x16xf32>, vector<16x1xf32>, vector<2x1xf32> -> vector<2x1xf32>
    %77 = vector.broadcast %76 : vector<2x1xf32> to vector<2x32xf32>
    %78 = arith.divf %75, %77 : vector<2x32xf32>
    %79 = arith.addf %78, %59 : vector<2x32xf32>
    %c0_35 = arith.constant 0 : index
    %c0_36 = arith.constant 0 : index
    %80 = vector.load %arg4[%c0_35, %c0_36] : memref<32x128xf32, #tpu.memory_space<vmem>>, vector<32x128xf32>
    %cst_37 = arith.constant dense<0.000000e+00> : vector<2x128xf32>
    %81 = tpu.matmul %79, %80, %cst_37 {dimension_numbers = #tpu.dot_dimension_numbers<[1], [0], [0], [1], [0, 0, 1, 1], [], []>} : vector<2x32xf32>, vector<32x128xf32>, vector<2x128xf32> -> vector<2x128xf32>
    %82 = tpu.iota {dimensions = array<i32: 1>} : vector<2x128xi32>
    %c32_i32 = arith.constant 32 : i32
    %83 = vector.broadcast %c32_i32 : i32 to vector<2x128xi32>
    %84 = arith.cmpi slt, %82, %83 : vector<2x128xi32>
    %cst_38 = arith.constant -1.000000e+30 : f32
    %85 = vector.broadcast %cst_38 : f32 to vector<2x128xf32>
    %86 = arith.select %84, %81, %85 : vector<2x128xi1>, vector<2x128xf32>
    %cst_39 = arith.constant dense<0xFF800000> : vector<2xf32>
    %87 = vector.multi_reduction <maximumf>, %86, %cst_39 [1] : vector<2x128xf32> to vector<2xf32>
    %88 = vector.shape_cast %87 : vector<2xf32> to vector<2x1xf32>
    %89 = vector.broadcast %88 : vector<2x1xf32> to vector<2x128xf32>
    %90 = arith.subf %86, %89 : vector<2x128xf32>
    %91 = math.exp %90 : vector<2x128xf32>
    %cst_40 = arith.constant dense<0.000000e+00> : vector<2xf32>
    %92 = vector.multi_reduction <add>, %91, %cst_40 [1] : vector<2x128xf32> to vector<2xf32>
    %93 = vector.shape_cast %92 : vector<2xf32> to vector<2x1xf32>
    %94 = math.log %93 : vector<2x1xf32>
    %95 = vector.broadcast %94 : vector<2x1xf32> to vector<2x128xf32>
    %96 = arith.subf %90, %95 : vector<2x128xf32>
    %c0_41 = arith.constant 0 : index
    %c0_42 = arith.constant 0 : index
    %97 = vector.load %arg11[%c0_41, %c0_42] : memref<2x128xf32, #tpu.memory_space<vmem>>, vector<2x128xf32>
    tpu.vector_store %arg11[%c0_41, %c0_42], %96 {strides = array<i32>} : memref<2x128xf32, #tpu.memory_space<vmem>>, vector<2x128xf32>,
    return
  }
  func.func @transform_0(%arg0: i32) -> (i32, i32) {
    %c0_i32 = arith.constant 0 : i32
    %c0_i32_0 = arith.constant 0 : i32
    return %arg0, %c0_i32 : i32, i32
  }
  func.func @transform_1(%arg0: i32) -> (i32, i32) {
    %c0_i32 = arith.constant 0 : i32
    %c0_i32_0 = arith.constant 0 : i32
    return %arg0, %c0_i32 : i32, i32
  }
  func.func @transform_2(%arg0: i32) -> (i32, i32) {
    %c0_i32 = arith.constant 0 : i32
    %c0_i32_0 = arith.constant 0 : i32
    %c0_i32_1 = arith.constant 0 : i32
    return %c0_i32, %c0_i32_0 : i32, i32
  }
  func.func @transform_3(%arg0: i32) -> (i32, i32) {
    %c0_i32 = arith.constant 0 : i32
    %c0_i32_0 = arith.constant 0 : i32
    %c0_i32_1 = arith.constant 0 : i32
    return %c0_i32, %c0_i32_0 : i32, i32
  }
  func.func @transform_4(%arg0: i32) -> (i32, i32) {
    %c0_i32 = arith.constant 0 : i32
    %c0_i32_0 = arith.constant 0 : i32
    %c0_i32_1 = arith.constant 0 : i32
    return %c0_i32, %c0_i32_0 : i32, i32
  }
  func.func @transform_5(%arg0: i32) -> (i32, i32) {
    %c0_i32 = arith.constant 0 : i32
    %c0_i32_0 = arith.constant 0 : i32
    %c0_i32_1 = arith.constant 0 : i32
    return %c0_i32, %c0_i32_0 : i32, i32
  }
  func.func @transform_6(%arg0: i32) -> (i32, i32) {
    %c0_i32 = arith.constant 0 : i32
    %c0_i32_0 = arith.constant 0 : i32
    %c0_i32_1 = arith.constant 0 : i32
    return %c0_i32, %c0_i32_0 : i32, i32
  }
  func.func @transform_7(%arg0: i32) -> (i32, i32) {
    %c0_i32 = arith.constant 0 : i32
    %c0_i32_0 = arith.constant 0 : i32
    %c0_i32_1 = arith.constant 0 : i32
    return %c0_i32, %c0_i32_0 : i32, i32
  }
  func.func @transform_8(%arg0: i32) -> (i32, i32) {
    %c0_i32 = arith.constant 0 : i32
    %c0_i32_0 = arith.constant 0 : i32
    %c0_i32_1 = arith.constant 0 : i32
    return %c0_i32, %c0_i32_0 : i32, i32
  }
  func.func @transform_9(%arg0: i32) -> (i32, i32) {
    %c0_i32 = arith.constant 0 : i32
    %c0_i32_0 = arith.constant 0 : i32
    %c0_i32_1 = arith.constant 0 : i32
    return %c0_i32, %c0_i32_0 : i32, i32
  }
  func.func @transform_10(%arg0: i32) -> (i32, i32) {
    %c0_i32 = arith.constant 0 : i32
    %c0_i32_0 = arith.constant 0 : i32
    return %arg0, %c0_i32 : i32, i32
  }
}

</mosaic_0001>

<bundles_post_ra>
// kernel: tpu_custom_call.1
= control target key start
LH: loop header
LB: loop body
LE: loop exit
PB: predicated region body
PF: predicated region fallthrough
CT: control target
= control target key end

     0   :  { %15 = vsyncpa [#allocation3], 0  ;;  %s2584_s0 = inlined_call_operand.vmem [shape: s32[96,1], index: 0, kind: input, shape index: {}]   ;;  %s2585_s1 = inlined_call_operand.hbm [shape: f32[2,128], index: 1, kind: input, shape index: {}]   ;;  %s2586_s2 = inlined_call_operand.hbm [shape: f32[128,128], index: 2, kind: input, shape index: {}]   ;;  %s2587_s3 = inlined_call_operand.hbm [shape: f32[32,128], index: 3, kind: input, shape index: {}]   ;;  %s2588_s4 = inlined_call_operand.vmem [shape: f32[96,128], index: 4, kind: input, shape index: {}]   ;;  %s2589_s5 = inlined_call_operand.vmem [shape: f32[16,96], index: 5, kind: input, shape index: {}]   ;;  %s2590_s6 = inlined_call_operand.vmem [shape: f32[16,2], index: 6, kind: input, shape index: {}]   ;;  %s2591_s7 = inlined_call_operand.hbm [shape: f32[2,16], index: 7, kind: input, shape index: {}]   ;;  %s2592_s8 = inlined_call_operand.vmem [shape: f32[16,32], index: 8, kind: input, shape index: {}]   ;;  %s2593_s9 = inlined_call_operand.hbm [shape: f32[16,32], index: 9, kind: input, shape index: {}]   ;;  %s2594_s10 = inlined_call_operand.hbm [shape: f32[2,128], index: 10, kind: output, shape index: {}]  }
   0x1   :  { %16 = vsyncpa [#allocation6], 0 }
   0x2   :  { %17 = vsyncpa [#allocation9], 0 }
   0x3   :  { %18 = vsyncpa [#allocation4], 0  ;;  %s2082_s13 = smov [#allocation5]  }
   0x4   :  { %s36_s14 = sshll.u32 %s2082_s13, 4  ;;  %s37_s14 = int_to_ptr.vmem [resolvable:$true] %s36_s14 }
   0x5   :  { %s1962_s15 = scalar_lea.vmem %s37_s14, 2048  ;;  %p1967_p1 = scmp.lt.s32.totalorder %s37_s14, %s37_s14 }
   0x6   :  { %p1963_p0 = scmp.ne.s32.totalorder %s37_s14, %s1962_s15  ;;  %p1968_p2 = scmp.lt.s32.totalorder %s1962_s15, %s1962_s15 }
   0x8   :  { %p1969_p3 = por %p1968_p2, %p1967_p1 }
   0xa   :  { %p1970_p4 = pnand %p1969_p3, %p1963_p0 }
   0xc   :  { %1973 = shalt.err (!%p1970_p4)
}
   0xd   :  { %s2083_s16 = smov 128   ;;  %s2084_s17 = smov 8  }
   0xe   :  { %42 = dma.hbm_to_vmem [thread:$0]  %s2586_s2, 2048, %s37_s14, [#allocation6], %s2083_s16, %s2083_s16, %s2084_s17  }
   0xf   :  { %s2085_s20 = smov [#allocation8]   ;;  %s2086_s22 = smov [#allocation2]  }
  0x10   :  { %s67_s21 = sshll.u32 %s2085_s20, 4  ;;  %s27_s23 = sshll.u32 %s2086_s22, 4  ;;  %s68_s21 = int_to_ptr.vmem [resolvable:$true] %s67_s21  ;;  %s28_s23 = int_to_ptr.vmem [resolvable:$true] %s27_s23 }
  0x11   :  { %s1982_s24 = scalar_lea.vmem %s68_s21, 32  ;;  %p1987_p6 = scmp.lt.s32.totalorder %s68_s21, %s68_s21 }
  0x12   :  { %p1983_p5 = scmp.ne.s32.totalorder %s68_s21, %s1982_s24  ;;  %p1988_p7 = scmp.lt.s32.totalorder %s1982_s24, %s1982_s24 }
  0x14   :  { %p1989_p8 = por %p1988_p7, %p1987_p6 }
  0x16   :  { %p1990_p9 = pnand %p1989_p8, %p1983_p5 }
  0x18   :  { %1993 = shalt.err (!%p1990_p9)
}
  0x19   :  { %70 = dma.hbm_to_vmem [thread:$0]  %s2591_s7, 32, %s68_s21, [#allocation9]  }
  0x1a   :  { %s2002_s27 = scalar_lea.vmem %s28_s23, 32  ;;  %p2007_p11 = scmp.lt.s32.totalorder %s28_s23, %s28_s23 }
  0x1b   :  { %p2003_p10 = scmp.ne.s32.totalorder %s28_s23, %s2002_s27  ;;  %p2008_p12 = scmp.lt.s32.totalorder %s2002_s27, %s2002_s27 }
  0x1d   :  { %p2009_p13 = por %p2008_p12, %p2007_p11 }
  0x1f   :  { %p2010_p0 = pnand %p2009_p13, %p2003_p10 }
  0x21   :  { %2013 = shalt.err (!%p2010_p0)
}
  0x22   :  { %30 = dma.hbm_to_vmem [thread:$0]  %s2585_s1, 32, %s28_s23, [#allocation3]  }
  0x23   :  { %s2087_s29 = smov [#allocation7]   ;;  %s2088_s11 = smov [#allocation10]  }
  0x24   :  { %s48_s30 = sshll.u32 %s2087_s29, 4  ;;  %s78_s12 = sshll.u32 %s2088_s11, 4  ;;  %s49_s30 = int_to_ptr.vmem [resolvable:$true] %s48_s30  ;;  %s79_s12 = int_to_ptr.vmem [resolvable:$true] %s78_s12 }
  0x25   :  { %s2022_s13 = scalar_lea.vmem %s49_s30, 512  ;;  %p2027_p2 = scmp.lt.s32.totalorder %s49_s30, %s49_s30 }
  0x26   :  { %p2023_p1 = scmp.ne.s32.totalorder %s49_s30, %s2022_s13  ;;  %p2028_p3 = scmp.lt.s32.totalorder %s2022_s13, %s2022_s13 }
  0x28   :  { %p2029_p4 = por %p2028_p3, %p2027_p2 }
  0x2a   :  { %p2030_p5 = pnand %p2029_p4, %p2023_p1 }
  0x2c   :  { %2033 = shalt.err (!%p2030_p5)
}
  0x2d   :  { %54 = dma.hbm_to_vmem [thread:$0]  %s2587_s3, 512, %s49_s30, [#allocation6], %s2083_s16, %s2083_s16, %s2084_s17  }
  0x2e   :  { %s2042_s1 = scalar_lea.vmem %s79_s12, 256  ;;  %p2047_p7 = scmp.lt.s32.totalorder %s79_s12, %s79_s12 }
  0x2f   :  { %p2043_p6 = scmp.ne.s32.totalorder %s79_s12, %s2042_s1  ;;  %p2048_p8 = scmp.lt.s32.totalorder %s2042_s1, %s2042_s1 }
  0x31   :  { %p2049_p9 = por %p2048_p8, %p2047_p7 }
  0x33   :  { %p2050_p10 = pnand %p2049_p9, %p2043_p6 }
  0x35   :  { %2053 = shalt.err (!%p2050_p10)
}
  0x36   :  { %84 = dma.hbm_to_vmem [thread:$0]  %s2593_s9, 256, %s79_s12, [#allocation9], %s2083_s16, %s2083_s16, %s2084_s17  }
  0x37   :  { %2074 = dma.done.wait [#allocation3], 32  }
  0x38   :  { %2075 = vsyncadd [#allocation3], 4294967264 }
  0x39   :  { %2076 = dma.done.wait [#allocation6], 2560  }
  0x3a   :  { %2077 = vsyncadd [#allocation6], 4294964736 }
  0x3b   :  { %2078 = dma.done.wait [#allocation9], 288  }
  0x3c   :  { %2079 = vsyncadd [#allocation9], 4294967008  ;;  %v2089_v0 = vmov 0   ;;  %v120_v1 = vld [vmem:[%s2584_s0 + $0x10] sm:$0xff]  ;;  %v118_v2 = vld [vmem:[%s2584_s0] sm:$0xff]  ;;  %v2090_v29 = vmov 0.0   ;;  %v116_v30 = vlaneseq }
  0x3d   :  { %1931 = vset.pattern.permute.xlu1 %v2089_v0  ;;  %1930 = vset.pattern.permute.xlu0 %v2089_v0  ;;  %v121_v3 = vld [vmem:[%s2584_s0 + $0x18] sm:$0xff]  ;;  %v119_v4 = vld [vmem:[%s2584_s0 + $0x8] sm:$0xff]  ;;  %v122_v8 = vld [vmem:[%s2584_s0 + $0x20] sm:$0xff]  ;;  %v2091_v34 = vmov 1.0   ;;  %vm2092_vm12 = vmmov 0   ;;  %vm353_vm13 = vcmask 785408  }
  0x3e   :  { %137 = vperm.xlu1 %1931, %v120_v1   ;;  %131 = vperm.xlu0 %1930, %v118_v2   ;;  %v2188_v5 = vld [vmem:[#allocation5 + $0x78] sm:$0xff]  ;;  %v2190_v6 = vld [vmem:[#allocation5 + $0x70] sm:$0xff]  ;;  %v123_v7 = vld [vmem:[%s2584_s0 + $0x28] sm:$0xff]  ;;  %v2277_v31 = vand.u32 127, %v116_v30  ;;  %vm607_vm14 = vcmask 1041408   ;;  %vm600_vm15 = vcmask 15360  }
  0x3f   :  { %1708 = vmatprep.subr.mxu0 %v2188_v5  ;;  %v2201_v9 = vld [vmem:[#allocation5 + $0x68] sm:$0xff]  ;;  %v125_v10 = vld [vmem:[%s2584_s0 + $0x38] sm:$0xff]  ;;  %v2211_v12 = vld [vmem:[#allocation5 + $0x60] sm:$0xff]  ;;  %s2094_s16 = smov 96   ;;  %s2095_s17 = smov 64  }
  0x40   :  { %1709 = vmatpush3.msra.mxu0 %v2188_v5  ;;  %v124_v11 = vld [vmem:[%s2584_s0 + $0x30] sm:$0xff]  ;;  %v2214_v13 = vld [vmem:[#allocation5 + $0x58] sm:$0xff]  ;;  %v127_v14 = vld [vmem:[%s2584_s0 + $0x48] sm:$0xff]  ;;  %s2096_s22 = smov [#allocation11]  }
  0x41   :  { %1710 = vmatprep.subr.mxu0 %v2190_v6  ;;  %v126_v15 = vld [vmem:[%s2584_s0 + $0x40] sm:$0xff]  ;;  %v2225_v16 = vld [vmem:[#allocation5 + $0x50] sm:$0xff]  ;;  %v2235_v19 = vld [vmem:[#allocation5 + $0x48] sm:$0xff]  ;;  %s1548_s23 = sshll.u32 %s2096_s22, 4  ;;  %s1549_s23 = int_to_ptr.vmem [resolvable:$true] %s1548_s23 }
  0x42   :  { %140 = vperm.xlu1 %1931, %v121_v3   ;;  %134 = vperm.xlu0 %1930, %v119_v4   ;;  %v129_v17 = vld [vmem:[%s2584_s0 + $0x58] sm:$0xff]  ;;  %v128_v18 = vld [vmem:[%s2584_s0 + $0x50] sm:$0xff]  ;;  %v2238_v20 = vld [vmem:[#allocation5 + $0x40] sm:$0xff]  ;;  %s2054_s24 = scalar_lea.vmem %s1549_s23, 32  ;;  %p2059_p12 = scmp.lt.s32.totalorder %s1549_s23, %s1549_s23 }
  0x43   :  { %1711 = vmatpush3.msra.mxu0 %v2190_v6  ;;  %v2242_v21 = vld [vmem:[#allocation5 + $0x38] sm:$0xff]  ;;  %v2246_v22 = vld [vmem:[#allocation5 + $0x30] sm:$0xff]  ;;  %v2250_v23 = vld [vmem:[#allocation5 + $0x28] sm:$0xff]  ;;  %p2055_p11 = scmp.ne.s32.totalorder %s1549_s23, %s2054_s24  ;;  %p2060_p13 = scmp.lt.s32.totalorder %s2054_s24, %s2054_s24 }
  0x44   :  { %1712 = vmatprep.subr.mxu0 %v2201_v9  ;;  %v2254_v24 = vld [vmem:[#allocation5 + $0x20] sm:$0xff]  ;;  %v2258_v25 = vld [vmem:[#allocation5 + $0x18] sm:$0xff]  ;;  %v2262_v26 = vld [vmem:[#allocation5 + $0x10] sm:$0xff] }
  0x45   :  { %1713 = vmatpush3.msra.mxu0 %v2201_v9  ;;  %v2266_v27 = vld [vmem:[#allocation5 + $0x8] sm:$0xff]  ;;  %v2270_v28 = vld [vmem:[#allocation5] sm:$0xff]  ;;  %v514_v45 = vld [vmem:[#allocation2] sm:$0x3]  ;;  %p2061_p0 = por %p2060_p13, %p2059_p12 }
  0x46   :  { %146 = vperm.xlu1 %1931, %v123_v7   ;;  %143 = vperm.xlu0 %1930, %v122_v8   ;;  %v2330_v46 = vld [vmem:[%s2589_s5] sm:$0xff]  ;;  %v340_v57 = vld [vmem:[%s2588_s4 + $0x58] sm:$0xff]  ;;  %v339_v59 = vld [vmem:[%s2588_s4 + $0x50] sm:$0xff] }
  0x47   :  { %1714 = vmatprep.subr.mxu0 %v2211_v12  ;;  %1782 = vmatprep.mubr.msk.f32.mxu1 %vm353_vm13, %v2330_v46  ;;  %v338_v61 = vld [vmem:[%s2588_s4 + $0x48] sm:$0xff]  ;;  %v337_v0 = vld [vmem:[%s2588_s4 + $0x40] sm:$0xff]  ;;  %v336_v2 = vld [vmem:[%s2588_s4 + $0x38] sm:$0xff]  ;;  %p2062_p1 = pnand %p2061_p0, %p2055_p11 }
  0x48   :  { %1715 = vmatpush3.msra.mxu0 %v2211_v12  ;;  %v335_v4 = vld [vmem:[%s2588_s4 + $0x30] sm:$0xff]  ;;  %v333_v8 = vld [vmem:[%s2588_s4 + $0x20] sm:$0xff] }
  0x49   :  { %1716 = vmatprep.subr.mxu0 %v2214_v13  ;;  %v2456_v30 = vld [vmem:[%s2592_s8] sm:$0xff] }
  0x4a   :  { %152 = vperm.xlu1 %1931, %v125_v10   ;;  %149 = vperm.xlu0 %1930, %v124_v11   ;;  %v332_v11 = vld [vmem:[%s2588_s4 + $0x18] sm:$0xff] }
  0x4b   :  { %1717 = vmatpush3.msra.mxu0 %v2214_v13 }
  0x4c   :  { %1718 = vmatprep.subr.mxu0 %v2225_v16 }
  0x4d   :  { %1719 = vmatpush3.msra.mxu0 %v2225_v16 }
  0x4e   :  { %158 = vperm.xlu1 %1931, %v127_v14   ;;  %155 = vperm.xlu0 %1930, %v126_v15   ;;  %v331_v14 = vld [vmem:[%s2588_s4 + $0x10] sm:$0xff] }
  0x4f   :  { %1720 = vmatprep.subr.mxu0 %v2235_v19 }
  0x50   :  { %1721 = vmatpush3.msra.mxu0 %v2235_v19 }
  0x51   :  { %1722 = vmatprep.subr.mxu0 %v2238_v20 }
  0x52   :  { %164 = vperm.xlu1 %1931, %v129_v17   ;;  %161 = vperm.xlu0 %1930, %v128_v18   ;;  %v329_v18 = vld [vmem:[%s2588_s4] sm:$0xff] }
  0x53   :  { %1723 = vmatpush3.msra.mxu0 %v2238_v20 }
  0x54   :  { %1724 = vmatprep.subr.mxu0 %v2242_v21 }
  0x55   :  { %1725 = vmatpush3.msra.mxu0 %v2242_v21 }
  0x56   :  { %1726 = vmatprep.subr.mxu0 %v2246_v22 }
  0x57   :  { %1727 = vmatpush3.msra.mxu0 %v2246_v22 }
  0x58   :  { %1728 = vmatprep.subr.mxu0 %v2250_v23 }
  0x59   :  { %1729 = vmatpush3.msra.mxu0 %v2250_v23 }
  0x5a   :  { %1730 = vmatprep.subr.mxu0 %v2254_v24 }
  0x5b   :  { %1731 = vmatpush3.msra.mxu0 %v2254_v24 }
  0x5c   :  { %1732 = vmatprep.subr.mxu0 %v2258_v25 }
  0x5d   :  { %1733 = vmatpush3.msra.mxu0 %v2258_v25 }
  0x5e   :  { %1734 = vmatprep.subr.mxu0 %v2262_v26 }
  0x5f   :  { %1735 = vmatpush3.msra.mxu0 %v2262_v26 }
  0x60   :  { %1736 = vmatprep.subr.mxu0 %v2266_v27 }
  0x61   :  { %1737 = vmatpush3.msra.mxu0 %v2266_v27 }
  0x62   :  { %1738 = vmatprep.subr.mxu0 %v2270_v28 }
  0x63   :  { %1739 = vmatpush3.msra.mxu0 %v2270_v28 }
  0x64   :  { %1812 = vmatprep.subr.mxu0 %v2090_v29 }
  0xb9   :  { %v138_v32 = vpop.permute.xlu1 %137  ;;  %v132_v33 = vpop.permute.xlu0 %131 }
  0xba   :  { %vm166_vm0 = vcmp.eq.s32.totalorder %v2277_v31, %v132_v33  ;;  %vm168_vm1 = vcmp.eq.s32.totalorder %v2277_v31, %v138_v32 }
  0xbb   :  { %1740 = vmatprep.mubr.msk.f32.mxu0 %vm166_vm0, %v2091_v34  ;;  %vm688_vm0 = vcmask 261120  }
  0xbd   :  { %v141_v35 = vpop.permute.xlu1 %140  ;;  %v135_v36 = vpop.permute.xlu0 %134 }
  0xbe   :  { %vm167_vm2 = vcmp.eq.s32.totalorder %v2277_v31, %v135_v36  ;;  %vm169_vm3 = vcmp.eq.s32.totalorder %v2277_v31, %v141_v35 }
  0xbf   :  { %1741 = vmatmul.mubr.msk.f32.vlgmr.msra.gmra.mxu0 %vm167_vm2, %v2091_v34  ;;  %vm1527_vm2 = vcmp.lt.s32.totalorder %v2277_v31, 32 }
  0xc0   :  { %1743 = vmatprep.mubr.msk.f32.mxu0 %vm168_vm1, %v2091_v34  ;;  %1813 = vmatpush3.msra.mxu0 %v2188_v5  ;;  %vm718_vm1 = vcmask 130048  }
  0xc1   :  { %v147_v37 = vpop.permute.xlu1 %146  ;;  %v144_v38 = vpop.permute.xlu0 %143  ;;  %1814 = vmatprep.subr.mxu0 %v2090_v29 }
  0xc2   :  { %vm170_vm4 = vcmp.eq.s32.totalorder %v2277_v31, %v144_v38  ;;  %1815 = vmatpush3.msra.mxu0 %v2190_v6  ;;  %vm171_vm5 = vcmp.eq.s32.totalorder %v2277_v31, %v147_v37  ;;  %v334_v6 = vld [vmem:[%s2588_s4 + $0x28] sm:$0xff] }
  0xc3   :  { %1744 = vmatmul.mubr.msk.f32.gmra.mxu0 %vm169_vm3, %v2091_v34  ;;  %1816 = vmatprep.subr.mxu0 %v2090_v29 }
  0xc4   :  { %1746 = vmatprep.mubr.msk.f32.mxu0 %vm170_vm4, %v2091_v34  ;;  %1817 = vmatpush3.msra.mxu0 %v2201_v9 }
  0xc5   :  { %v153_v39 = vpop.permute.xlu1 %152  ;;  %v150_v40 = vpop.permute.xlu0 %149  ;;  %1818 = vmatprep.subr.mxu0 %v2090_v29 }
  0xc6   :  { %vm172_vm6 = vcmp.eq.s32.totalorder %v2277_v31, %v150_v40  ;;  %1819 = vmatpush3.msra.mxu0 %v2211_v12  ;;  %vm173_vm7 = vcmp.eq.s32.totalorder %v2277_v31, %v153_v39  ;;  %v2464_v40 = vld [vmem:[#allocation10] sm:$0xff] }
  0xc7   :  { %1747 = vmatmul.mubr.msk.f32.gmra.mxu0 %vm171_vm5, %v2091_v34  ;;  %1820 = vmatprep.subr.mxu0 %v2090_v29 }
  0xc8   :  { %1749 = vmatprep.mubr.msk.f32.mxu0 %vm172_vm6, %v2091_v34  ;;  %1821 = vmatpush3.msra.mxu0 %v2214_v13 }
  0xc9   :  { %v159_v41 = vpop.permute.xlu1 %158  ;;  %v156_v42 = vpop.permute.xlu0 %155  ;;  %1822 = vmatprep.subr.mxu0 %v2090_v29 }
  0xca   :  { %vm174_vm8 = vcmp.eq.s32.totalorder %v2277_v31, %v156_v42  ;;  %1823 = vmatpush3.msra.mxu0 %v2225_v16  ;;  %vm175_vm9 = vcmp.eq.s32.totalorder %v2277_v31, %v159_v41  ;;  %v330_v16 = vld [vmem:[%s2588_s4 + $0x8] sm:$0xff] }
  0xcb   :  { %1750 = vmatmul.mubr.msk.f32.gmra.mxu0 %vm173_vm7, %v2091_v34  ;;  %1824 = vmatprep.subr.mxu0 %v2090_v29  ;;  %v2468_v41 = vld [vmem:[#allocation10 + $0x8] sm:$0xff] }
  0xcc   :  { %1752 = vmatprep.mubr.msk.f32.mxu0 %vm174_vm8, %v2091_v34  ;;  %1825 = vmatpush3.msra.mxu0 %v2235_v19 }
  0xcd   :  { %v162_v43 = vpop.permute.xlu0 %161  ;;  %1826 = vmatprep.subr.mxu0 %v2090_v29  ;;  %v165_v44 = vpop.permute.xlu1 %164 }
  0xce   :  { %vm176_vm10 = vcmp.eq.s32.totalorder %v2277_v31, %v162_v43  ;;  %1827 = vmatpush3.msra.mxu0 %v2238_v20  ;;  %vm177_vm11 = vcmp.eq.s32.totalorder %v2277_v31, %v165_v44 }
  0xcf   :  { %1753 = vmatmul.mubr.msk.f32.gmra.mxu0 %vm175_vm9, %v2091_v34  ;;  %1828 = vmatprep.subr.mxu0 %v2090_v29 }
  0xd0   :  { %1755 = vmatprep.mubr.msk.f32.mxu0 %vm176_vm10, %v2091_v34  ;;  %1829 = vmatpush3.msra.mxu0 %v2242_v21  ;;  %v328_v21 = vld [vmem:[%s2589_s5 + $0x8] sm:$0xff] }
  0xd1   :  { %1830 = vmatprep.subr.mxu0 %v2090_v29 }
  0xd2   :  { %1831 = vmatpush3.msra.mxu0 %v2246_v22  ;;  %v2420_v22 = vld [vmem:[%s2590_s6] sm:$0xff] }
  0xd3   :  { %1756 = vmatmul.mubr.msk.f32.gmra.mxu0 %vm177_vm11, %v2091_v34  ;;  %1832 = vmatprep.subr.mxu0 %v2090_v29 }
  0xd4   :  { %1833 = vmatpush3.msra.mxu0 %v2250_v23  ;;  %1844 = vmatprep.mubr.msk.f32.mxu0 %vm2092_vm12, %v2090_v29  ;;  %v2433_v23 = vld [vmem:[%s2590_s6 + $0x8] sm:$0xff] }
  0xd5   :  { %1834 = vmatprep.subr.mxu0 %v2090_v29 }
  0xd6   :  { %1835 = vmatpush3.msra.mxu0 %v2254_v24 }
  0xd7   :  { %1836 = vmatprep.subr.mxu0 %v2090_v29 }
  0xd8   :  { %1837 = vmatpush3.msra.mxu0 %v2258_v25 }
  0xd9   :  { %1838 = vmatprep.subr.mxu0 %v2090_v29 }
  0xda   :  { %1839 = vmatpush3.msra.mxu0 %v2262_v26 }
  0xdb   :  { %1840 = vmatprep.subr.mxu0 %v2090_v29 }
  0xdc   :  { %1841 = vmatpush3.msra.mxu0 %v2266_v27  ;;  %v2449_v27 = vld [vmem:[%s2592_s8 + $0x8] sm:$0xff]  ;;  %s2093_s8 = smov 32  }
  0xdd   :  { %1842 = vmatprep.subr.mxu0 %v2090_v29 }
  0xde   :  { %1843 = vmatpush3.msra.mxu0 %v2270_v28 }
  0xdf   :  { %1845 = vmatmul.mubr.f32.vlgmr.msra.gmra.mxu0 %v514_v45  ;;  %1871 = vmatprep.subr.mxu0 %v2090_v29 }
  0xe0   :  { %1875 = vmatprep.mubr.msk.f32.mxu0 %vm2092_vm12, %v2090_v29 }
 0x17f   :  { %v2334_v47 = vpop.f32.mrf.mxu0 }
 0x180   :  { %v342_v19 = vmul.f32 %v2334_v47, %v330_v16 }
 0x181   :  { %v2336_v48 = vpop.f32.mrf.mxu0 }
 0x182   :  { %v341_v20 = vmul.f32 %v329_v18, %v2336_v48 }
 0x183   :  { %v2338_v49 = vpop.f32.mrf.mxu0 }
 0x184   :  { %v344_v15 = vmul.f32 %v2338_v49, %v332_v11 }
 0x185   :  { %v2340_v50 = vpop.f32.mrf.mxu0 }
 0x186   :  { %v343_v17 = vmul.f32 %v331_v14, %v2340_v50 }
 0x187   :  { %v2342_v51 = vpop.f32.mrf.mxu0 }
 0x188   :  { %v346_v10 = vmul.f32 %v2342_v51, %v334_v6 }
 0x189   :  { %v2344_v52 = vpop.f32.mrf.mxu0 }
 0x18a   :  { %v345_v13 = vmul.f32 %v333_v8, %v2344_v52 }
 0x18b   :  { %v2346_v53 = vpop.f32.mrf.mxu0 }
 0x18c   :  { %v348_v5 = vmul.f32 %v2346_v53, %v336_v2 }
 0x18d   :  { %v2348_v54 = vpop.f32.mrf.mxu0 }
 0x18e   :  { %v347_v7 = vmul.f32 %v335_v4, %v2348_v54 }
 0x18f   :  { %v1754_v55 = vpop.f32.mrf.mxu0 }
 0x190   :  { %v350_v1 = vmul.f32 %v1754_v55, %v338_v61 }
 0x191   :  { %v308_v56 = vpop.f32.mrf.mxu0 }
 0x192   :  { %v349_v3 = vmul.f32 %v337_v0, %v308_v56  ;;  %v2478_v0 = vld [vmem:[#allocation8] sm:$0x3] }
 0x193   :  { %v1757_v58 = vpop.f32.mrf.mxu0 }
 0x194   :  { %v352_v60 = vmul.f32 %v1757_v58, %v340_v57 }
 0x195   :  { %v318_v62 = vpop.f32.mrf.mxu0 }
 0x196   :  { %v351_v63 = vmul.f32 %v339_v59, %v318_v62  ;;  %1758 = vmatprep.subr.mxu1 %v352_v60 }
 0x197   :  { %1759 = vmatpush3.msra.mxu1 %v352_v60 }
 0x198   :  { %1760 = vmatprep.subr.mxu1 %v351_v63 }
 0x199   :  { %1761 = vmatpush3.msra.mxu1 %v351_v63 }
 0x19a   :  { %1762 = vmatprep.subr.mxu1 %v350_v1 }
 0x19b   :  { %1763 = vmatpush3.msra.mxu1 %v350_v1 }
 0x19c   :  { %1764 = vmatprep.subr.mxu1 %v349_v3 }
 0x19d   :  { %1765 = vmatpush3.msra.mxu1 %v349_v3 }
 0x19e   :  { %1766 = vmatprep.subr.mxu1 %v348_v5 }
 0x19f   :  { %1767 = vmatpush3.msra.mxu1 %v348_v5  ;;  %v2376_v9 = vpop.f32.mrf.mxu0 }
 0x1a0   :  { %1768 = vmatprep.subr.mxu1 %v347_v7 }
 0x1a1   :  { %1769 = vmatpush3.msra.mxu1 %v347_v7  ;;  %v1846_v12 = vpop.f32.mrf.mxu0 }
 0x1a2   :  { %1770 = vmatprep.subr.mxu1 %v346_v10 }
 0x1a3   :  { %1771 = vmatpush3.msra.mxu1 %v346_v10 }
 0x1a4   :  { %1772 = vmatprep.subr.mxu1 %v345_v13 }
 0x1a5   :  { %1773 = vmatpush3.msra.mxu1 %v345_v13 }
 0x1a6   :  { %1774 = vmatprep.subr.mxu1 %v344_v15 }
 0x1a7   :  { %1775 = vmatpush3.msra.mxu1 %v344_v15 }
 0x1a8   :  { %1776 = vmatprep.subr.mxu1 %v343_v17 }
 0x1a9   :  { %1777 = vmatpush3.msra.mxu1 %v343_v17 }
 0x1aa   :  { %1778 = vmatprep.subr.mxu1 %v342_v19 }
 0x1ab   :  { %1779 = vmatpush3.msra.mxu1 %v342_v19 }
 0x1ac   :  { %1780 = vmatprep.subr.mxu1 %v341_v20 }
 0x1ad   :  { %1781 = vmatpush3.msra.mxu1 %v341_v20 }
 0x1ae   :  { %1783 = vmatmul.mubr.msk.f32.vlgmr.msra.gmra.mxu1 %vm353_vm13, %v328_v21  ;;  %1785 = vmatprep.subr.mxu1 %v1757_v58 }
 0x1af   :  { %1786 = vmatpush3.msra.mxu1 %v1757_v58  ;;  %1809 = vmatprep.mubr.msk.f32.mxu1 %vm353_vm13, %v2330_v46 }
 0x1b0   :  { %1787 = vmatprep.subr.mxu1 %v318_v62 }
 0x1b1   :  { %1788 = vmatpush3.msra.mxu1 %v318_v62 }
 0x1b2   :  { %1789 = vmatprep.subr.mxu1 %v1754_v55 }
 0x1b3   :  { %1790 = vmatpush3.msra.mxu1 %v1754_v55 }
 0x1b4   :  { %1791 = vmatprep.subr.mxu1 %v308_v56 }
 0x1b5   :  { %1792 = vmatpush3.msra.mxu1 %v308_v56 }
 0x1b6   :  { %1793 = vmatprep.subr.mxu1 %v2346_v53 }
 0x1b7   :  { %1794 = vmatpush3.msra.mxu1 %v2346_v53 }
 0x1b8   :  { %1795 = vmatprep.subr.mxu1 %v2348_v54 }
 0x1b9   :  { %1796 = vmatpush3.msra.mxu1 %v2348_v54 }
 0x1ba   :  { %1797 = vmatprep.subr.mxu1 %v2342_v51 }
 0x1bb   :  { %1798 = vmatpush3.msra.mxu1 %v2342_v51 }
 0x1bc   :  { %1799 = vmatprep.subr.mxu1 %v2344_v52 }
 0x1bd   :  { %1800 = vmatpush3.msra.mxu1 %v2344_v52 }
 0x1be   :  { %1801 = vmatprep.subr.mxu1 %v2338_v49 }
 0x1bf   :  { %1802 = vmatpush3.msra.mxu1 %v2338_v49 }
 0x1c0   :  { %1803 = vmatprep.subr.mxu1 %v2340_v50 }
 0x1c1   :  { %1804 = vmatpush3.msra.mxu1 %v2340_v50 }
 0x1c2   :  { %1805 = vmatprep.subr.mxu1 %v2334_v47 }
 0x1c3   :  { %1806 = vmatpush3.msra.mxu1 %v2334_v47 }
 0x1c4   :  { %1807 = vmatprep.subr.mxu1 %v2336_v48 }
 0x1c5   :  { %1808 = vmatpush3.msra.mxu1 %v2336_v48 }
 0x1c6   :  { %1810 = vmatmul.mubr.msk.f32.vlgmr.msra.gmra.mxu1 %vm353_vm13, %v328_v21  ;;  %1847 = vmatprep.subr.msk.mxu1 %vm607_vm14, %v2376_v9 }
 0x1c7   :  { %1848 = vmatpush3.msk.msra.mxu1 %vm607_vm14, %v2376_v9  ;;  %1849 = vmatprep.mubr.msk.f32.mxu1 %vm600_vm15, %v2420_v22 }
 0x1c8   :  { %1852 = vmatprep.subr.mxu1 %v2090_v29 }
 0x1ca   :  { %1850 = vmatmul.mubr.msk.f32.vlgmr.msra.gmra.mxu1 %vm600_vm15, %v2433_v23 }
 0x1cb   :  { %1856 = vmatprep.mubr.msk.f32.mxu1 %vm2092_vm12, %v2090_v29 }
 0x26e   :  { %v2440_v24 = vpop.f32.mrf.mxu1 }
 0x26f   :  { %v589_v32 = vadd.f32 %v2440_v24, %v2449_v27 }
 0x270   :  { %v2442_v25 = vpop.f32.mrf.mxu1 }
 0x271   :  { %v588_v35 = vadd.f32 %v2456_v30, %v2442_v25 }
 0x286   :  { %v2444_v26 = vpop.f32.mrf.mxu1 }
 0x288   :  { %v2451_v28 = vpop.f32.mrf.mxu1 }
 0x28a   :  { %v1851_v33 = vpop.f32.mrf.mxu1 }
 0x28b   :  { %v687_v34 = vmul.f32 %v1851_v33, %v589_v32 }
 0x28c   :  { %v677_v36 = vpop.f32.mrf.mxu1 }
 0x28d   :  { %v686_v37 = vmul.f32 %v677_v36, %v588_v35  ;;  %v692_v38 = vsel %vm688_vm0, %v687_v34, 0.0 }
 0x28e   :  { %693 = vadd.xlane.f32.xlu1 %v692_v38 }
 0x28f   :  { %v689_v39 = vsel %vm688_vm0, %v686_v37, 0.0 }
 0x290   :  { %690 = vadd.xlane.f32.xlu0 %v689_v39 }
 0x29f   :  { %592 = vrot.lane.b32.xlu1 %v2464_v40, %s2093_s8 }
 0x2a6   :  { %594 = vrot.lane.b32.xlu0 %v2468_v41, %s2093_s8 }
 0x317   :  { %v694_v42 = vpop.xlane.xlu1 %693 }
 0x319   :  { %v691_v43 = vpop.xlane.xlu0 %690 }
 0x31a   :  { %v695_v44 = vmax.f32 %v691_v43, %v694_v42 }
 0x31b   :  { %v593_v55 = vpop.permute.xlu1 %592 }
 0x31c   :  { %v696_v45 = vrot.slane %v695_v44, 4  ;;  %v598_v57 = vadd.f32 %v593_v55, %v2451_v28 }
 0x31d   :  { %v595_v56 = vpop.permute.xlu0 %594 }
 0x31e   :  { %v697_v46 = vmax.f32 %v695_v44, %v696_v45  ;;  %v599_v59 = vadd.f32 %v2444_v26, %v595_v56 }
 0x320   :  { %v698_v47 = vrot.slane %v697_v46, 2 }
 0x322   :  { %v699_v48 = vmax.f32 %v697_v46, %v698_v47 }
 0x324   :  { %v700_v49 = vrot.slane %v699_v48, 1 }
 0x326   :  { %v701_v50 = vmax.f32 %v699_v48, %v700_v49 }
 0x328   :  { %v702_v51 = vsub.f32 %v691_v43, %v701_v50  ;;  %v703_v52 = vsub.f32 %v694_v42, %v701_v50 }
 0x32a   :  { %v704_v53 = vmul.f32 1.442695, %v702_v51  ;;  %v706_v54 = vmul.f32 1.442695, %v703_v52 }
 0x32c   :  { %1932 = vpow2.f32 %v704_v53 }
 0x32d   :  { %1934 = vpow2.f32 %v706_v54 }
 0x339   :  { %v1933_v58 = vpop.eup %1932 }
 0x33a   :  { %v1935_v60 = vpop.eup %1934  ;;  %v708_v61 = vmul.f32 %v1933_v58, %v598_v57 }
 0x33b   :  { %v709_v62 = vmul.f32 %v1935_v60, %v599_v59 }
 0x33c   :  { %712 = vrot.lane.b32.xlu1 %v708_v61, %s2094_s16 }
 0x33d   :  { %714 = vrot.lane.b32.xlu0 %v709_v62, %s2094_s16 }
 0x340   :  { %872 = vrot.lane.b32.xlu1 %v2456_v30, %s2093_s8 }
 0x3ae   :  { %v713_v1 = vpop.permute.xlu1 %712 }
 0x3af   :  { %v715_v63 = vpop.permute.xlu0 %714 }
 0x3b0   :  { %1853 = vmatpush3.msra.mxu1 %v715_v63 }
 0x3b1   :  { %1854 = vmatprep.subr.mxu1 %v2090_v29 }
 0x3b2   :  { %1855 = vmatpush3.msra.mxu1 %v713_v1  ;;  %v873_v13 = vpop.permute.xlu1 %872 }
 0x3b3   :  { %1857 = vmatmul.mubr.msk.f32.vlgmr.msra.gmra.mxu1 %vm718_vm1, %v2478_v0  ;;  %1859 = vmatprep.subr.mxu1 %v2090_v29  ;;  %v878_v16 = vadd.f32 %v873_v13, %v2442_v25 }
 0x3b4   :  { %1860 = vmatpush3.msra.mxu1 %v1935_v60  ;;  %1863 = vmatprep.mubr.msk.f32.mxu1 %vm2092_vm12, %v2090_v29 }
 0x3b5   :  { %1861 = vmatprep.subr.mxu1 %v2090_v29 }
 0x3b6   :  { %1862 = vmatpush3.msra.mxu1 %v1933_v58 }
 0x3b7   :  { %1864 = vmatmul.mubr.msk.f32.vlgmr.msra.gmra.mxu1 %vm718_vm1, %v2478_v0 }
 0x3b8   :  { %1868 = vmatprep.mubr.msk.f32.mxu1 %vm600_vm15, %v2420_v22 }
 0x473   :  { %v788_v2 = vpop.f32.mrf.mxu1 }
 0x475   :  { %v1858_v3 = vpop.f32.mrf.mxu1 }
 0x477   :  { %v858_v4 = vpop.f32.mrf.mxu1 }
 0x478   :  { %864 = vperm.xlu0 %1930, %v858_v4  }
 0x479   :  { %v1865_v5 = vpop.f32.mrf.mxu1 }
 0x47c   :  { %874 = vrot.lane.b32.xlu0 %v2449_v27, %s2093_s8 }
 0x4f3   :  { %v865_v6 = vpop.permute.xlu0 %864 }
 0x4f4   :  { %1936 = vrcp.f32 %v865_v6 }
 0x501   :  { %v1937_v7 = vpop.eup %1936 }
 0x502   :  { %v868_v8 = vmul.f32 %v1937_v7, %v788_v2 }
 0x504   :  { %v2494_v10 = vadd.f32 %v868_v8, %v2376_v9  ;;  %v875_v9 = vpop.permute.xlu0 %874 }
 0x505   :  { %v879_v14 = vadd.f32 %v2440_v24, %v875_v9 }
 0x506   :  { %1866 = vmatprep.subr.msk.mxu1 %vm607_vm14, %v2494_v10 }
 0x507   :  { %1867 = vmatpush3.msk.msra.mxu1 %vm607_vm14, %v2494_v10 }
 0x508   :  { %1869 = vmatmul.mubr.msk.f32.vlgmr.msra.gmra.mxu1 %vm600_vm15, %v2433_v23  ;;  %1878 = vmatprep.subr.mxu1 %v2090_v29 }
 0x509   :  { %1882 = vmatprep.mubr.msk.f32.mxu1 %vm2092_vm12, %v2090_v29 }
 0x5c8   :  { %v1870_v11 = vpop.f32.mrf.mxu1 }
 0x5c9   :  { %970 = vrot.lane.b32.xlu0 %v1870_v11, %s2093_s8 }
 0x5ca   :  { %v957_v12 = vpop.f32.mrf.mxu1 }
 0x5cb   :  { %968 = vrot.lane.b32.xlu1 %v957_v12, %s2093_s8 }
 0x63b   :  { %v971_v15 = vpop.permute.xlu0 %970 }
 0x63c   :  { %v975_v17 = vmul.f32 %v971_v15, %v879_v14 }
 0x63d   :  { %v969_v18 = vpop.permute.xlu1 %968 }
 0x63e   :  { %v974_v19 = vmul.f32 %v969_v18, %v878_v16  ;;  %980 = vrot.lane.b32.xlu0 %v975_v17, %s2094_s16 }
 0x640   :  { %978 = vrot.lane.b32.xlu1 %v974_v19, %s2094_s16 }
 0x6b0   :  { %v981_v20 = vpop.permute.xlu0 %980 }
 0x6b1   :  { %v987_v21 = vsel %vm688_vm0, %v981_v20, 0.0 }
 0x6b2   :  { %988 = vadd.xlane.f32.xlu0 %v987_v21  ;;  %v979_v32 = vpop.permute.xlu1 %978 }
 0x6b3   :  { %v984_v33 = vsel %vm688_vm0, %v979_v32, 0.0 }
 0x6b4   :  { %985 = vadd.xlane.f32.xlu1 %v984_v33 }
 0x6c5   :  { %880 = vrot.lane.b32.xlu1 %v2464_v40, %s2095_s17 }
 0x6c8   :  { %882 = vrot.lane.b32.xlu0 %v2468_v41, %s2095_s17 }
 0x73b   :  { %v989_v34 = vpop.xlane.xlu0 %988 }
 0x73d   :  { %v986_v35 = vpop.xlane.xlu1 %985 }
 0x73e   :  { %v990_v36 = vmax.f32 %v986_v35, %v989_v34 }
 0x73f   :  { %v883_v50 = vpop.permute.xlu0 %882 }
 0x740   :  { %v991_v37 = vrot.slane %v990_v36, 4  ;;  %v887_v53 = vadd.f32 %v2444_v26, %v883_v50 }
 0x741   :  { %v881_v49 = vpop.permute.xlu1 %880 }
 0x742   :  { %v992_v38 = vmax.f32 %v990_v36, %v991_v37  ;;  %v886_v51 = vadd.f32 %v881_v49, %v2451_v28 }
 0x744   :  { %v993_v39 = vrot.slane %v992_v38, 2 }
 0x746   :  { %v994_v42 = vmax.f32 %v992_v38, %v993_v39 }
 0x748   :  { %v995_v43 = vrot.slane %v994_v42, 1 }
 0x74a   :  { %v996_v44 = vmax.f32 %v994_v42, %v995_v43 }
 0x74c   :  { %v997_v45 = vsub.f32 %v986_v35, %v996_v44  ;;  %v998_v46 = vsub.f32 %v989_v34, %v996_v44 }
 0x74e   :  { %v999_v47 = vmul.f32 1.442695, %v997_v45  ;;  %v1001_v48 = vmul.f32 1.442695, %v998_v46  ;;  %v1452_v46 = vld [vmem:[#allocation7 + $0x10] sm:$0xff] }
 0x750   :  { %1938 = vpow2.f32 %v999_v47  ;;  %v1451_v47 = vld [vmem:[#allocation7 + $0x8] sm:$0xff] }
 0x751   :  { %1940 = vpow2.f32 %v1001_v48 }
 0x75d   :  { %v1939_v52 = vpop.eup %1938 }
 0x75e   :  { %v1941_v54 = vpop.eup %1940  ;;  %v1003_v55 = vmul.f32 %v1939_v52, %v886_v51 }
 0x75f   :  { %v1004_v56 = vmul.f32 %v1941_v54, %v887_v53  ;;  %1879 = vmatpush3.msra.mxu1 %v1941_v54 }
 0x760   :  { %1880 = vmatprep.subr.mxu1 %v2090_v29  ;;  %1007 = vrot.lane.b32.xlu0 %v1003_v55, %s2095_s17 }
 0x761   :  { %1009 = vrot.lane.b32.xlu1 %v1004_v56, %s2095_s17  ;;  %1881 = vmatpush3.msra.mxu1 %v1939_v52 }
 0x762   :  { %1883 = vmatmul.mubr.msk.f32.vlgmr.msra.gmra.mxu1 %vm718_vm1, %v2478_v0  ;;  %1890 = vmatprep.subr.mxu1 %v2090_v29 }
 0x763   :  { %1894 = vmatprep.mubr.msk.f32.mxu1 %vm2092_vm12, %v2090_v29 }
 0x764   :  { %1161 = vrot.lane.b32.xlu0 %v2456_v30, %s2095_s17 }
 0x7d2   :  { %v1008_v58 = vpop.permute.xlu0 %1007 }
 0x7d3   :  { %v1010_v57 = vpop.permute.xlu1 %1009 }
 0x7d4   :  { %1872 = vmatpush3.msra.mxu0 %v1010_v57 }
 0x7d5   :  { %1873 = vmatprep.subr.mxu0 %v2090_v29 }
 0x7d6   :  { %1874 = vmatpush3.msra.mxu0 %v1008_v58  ;;  %v1162_v4 = vpop.permute.xlu0 %1161 }
 0x7d7   :  { %1876 = vmatmul.mubr.msk.f32.vlgmr.msra.gmra.mxu0 %vm718_vm1, %v2478_v0  ;;  %v1167_v7 = vadd.f32 %v1162_v4, %v2442_v25 }
 0x7d8   :  { %1887 = vmatprep.mubr.msk.f32.mxu0 %vm600_vm15, %v2420_v22 }
 0x822   :  { %v1149_v59 = vpop.f32.mrf.mxu1 }
 0x823   :  { %1155 = vperm.xlu1 %1931, %v1149_v59  }
 0x824   :  { %v1884_v60 = vpop.f32.mrf.mxu1 }
 0x827   :  { %1163 = vrot.lane.b32.xlu1 %v2449_v27, %s2095_s17 }
 0x897   :  { %v1079_v61 = vpop.f32.mrf.mxu0 }
 0x899   :  { %v1877_v30 = vpop.f32.mrf.mxu0 }
 0x89e   :  { %v1156_v62 = vpop.permute.xlu1 %1155 }
 0x89f   :  { %1942 = vrcp.f32 %v1156_v62 }
 0x8a2   :  { %v1164_v3 = vpop.permute.xlu1 %1163 }
 0x8a3   :  { %v1168_v5 = vadd.f32 %v2440_v24, %v1164_v3 }
 0x8ac   :  { %v1943_v63 = vpop.eup %1942 }
 0x8ad   :  { %v1159_v1 = vmul.f32 %v1943_v63, %v1079_v61 }
 0x8af   :  { %v2537_v2 = vadd.f32 %v1159_v1, %v2494_v10 }
 0x8b1   :  { %1885 = vmatprep.subr.msk.mxu0 %vm607_vm14, %v2537_v2 }
 0x8b2   :  { %1886 = vmatpush3.msk.msra.mxu0 %vm607_vm14, %v2537_v2 }
 0x8b3   :  { %1888 = vmatmul.mubr.msk.f32.vlgmr.msra.gmra.mxu0 %vm600_vm15, %v2433_v23  ;;  %1897 = vmatprep.subr.mxu0 %v2090_v29 }
 0x8b4   :  { %1901 = vmatprep.mubr.msk.f32.mxu0 %vm2092_vm12, %v2090_v29 }
 0x973   :  { %v1889_v22 = vpop.f32.mrf.mxu0 }
 0x974   :  { %1259 = vrot.lane.b32.xlu1 %v1889_v22, %s2095_s17 }
 0x975   :  { %v1246_v27 = vpop.f32.mrf.mxu0 }
 0x976   :  { %1257 = vrot.lane.b32.xlu0 %v1246_v27, %s2095_s17 }
 0x9e6   :  { %v1260_v6 = vpop.permute.xlu1 %1259 }
 0x9e7   :  { %v1264_v8 = vmul.f32 %v1260_v6, %v1168_v5 }
 0x9e8   :  { %v1258_v23 = vpop.permute.xlu0 %1257 }
 0x9e9   :  { %v1263_v10 = vmul.f32 %v1258_v23, %v1167_v7  ;;  %1269 = vrot.lane.b32.xlu1 %v1264_v8, %s2095_s17 }
 0x9eb   :  { %1267 = vrot.lane.b32.xlu0 %v1263_v10, %s2095_s17 }
 0xa5b   :  { %v1270_v11 = vpop.permute.xlu1 %1269 }
 0xa5c   :  { %v1276_v12 = vsel %vm688_vm0, %v1270_v11, 0.0 }
 0xa5d   :  { %v1268_v9 = vpop.permute.xlu0 %1267  ;;  %1277 = vadd.xlane.f32.xlu1 %v1276_v12 }
 0xa5e   :  { %v1273_v13 = vsel %vm688_vm0, %v1268_v9, 0.0 }
 0xa5f   :  { %1274 = vadd.xlane.f32.xlu0 %v1273_v13 }
 0xa6e   :  { %1169 = vrot.lane.b32.xlu1 %v2464_v40, %s2094_s16 }
 0xa75   :  { %1171 = vrot.lane.b32.xlu0 %v2468_v41, %s2094_s16 }
 0xae6   :  { %v1278_v24 = vpop.xlane.xlu1 %1277 }
 0xae8   :  { %v1275_v25 = vpop.xlane.xlu0 %1274 }
 0xae9   :  { %v1279_v14 = vmax.f32 %v1275_v25, %v1278_v24 }
 0xaea   :  { %v1170_v35 = vpop.permute.xlu1 %1169 }
 0xaeb   :  { %v1280_v15 = vrot.slane %v1279_v14, 4  ;;  %v1175_v36 = vadd.f32 %v1170_v35, %v2451_v28 }
 0xaec   :  { %v1172_v40 = vpop.permute.xlu0 %1171 }
 0xaed   :  { %v1281_v16 = vmax.f32 %v1279_v14, %v1280_v15  ;;  %v1176_v37 = vadd.f32 %v2444_v26, %v1172_v40  ;;  %v1453_v26 = vld [vmem:[#allocation7 + $0x18] sm:$0xff] }
 0xaef   :  { %v1282_v17 = vrot.slane %v1281_v16, 2 }
 0xaf1   :  { %v1283_v18 = vmax.f32 %v1281_v16, %v1282_v17 }
 0xaf3   :  { %v1284_v19 = vrot.slane %v1283_v18, 1 }
 0xaf5   :  { %v1285_v20 = vmax.f32 %v1283_v18, %v1284_v19 }
 0xaf7   :  { %v1286_v21 = vsub.f32 %v1275_v25, %v1285_v20  ;;  %v1287_v32 = vsub.f32 %v1278_v24, %v1285_v20 }
 0xaf9   :  { %v1288_v33 = vmul.f32 1.442695, %v1286_v21  ;;  %v1290_v34 = vmul.f32 1.442695, %v1287_v32 }
 0xafb   :  { %1944 = vpow2.f32 %v1288_v33 }
 0xafc   :  { %1946 = vpow2.f32 %v1290_v34 }
 0xb08   :  { %v1945_v41 = vpop.eup %1944 }
 0xb09   :  { %v1947_v38 = vpop.eup %1946  ;;  %v1292_v39 = vmul.f32 %v1945_v41, %v1175_v36 }
 0xb0a   :  { %v1293_v42 = vmul.f32 %v1947_v38, %v1176_v37  ;;  %1898 = vmatpush3.msra.mxu0 %v1947_v38 }
 0xb0b   :  { %1899 = vmatprep.subr.mxu0 %v2090_v29  ;;  %1296 = vrot.lane.b32.xlu1 %v1292_v39, %s2093_s8 }
 0xb0c   :  { %1298 = vrot.lane.b32.xlu0 %v1293_v42, %s2093_s8  ;;  %1900 = vmatpush3.msra.mxu0 %v1945_v41 }
 0xb0d   :  { %1902 = vmatmul.mubr.msk.f32.vlgmr.msra.gmra.mxu0 %vm718_vm1, %v2478_v0 }
 0xb7d   :  { %v1297_v28 = vpop.permute.xlu1 %1296 }
 0xb7e   :  { %v1299_v43 = vpop.permute.xlu0 %1298 }
 0xb7f   :  { %1891 = vmatpush3.msra.mxu1 %v1299_v43 }
 0xb80   :  { %1892 = vmatprep.subr.mxu1 %v2090_v29 }
 0xb81   :  { %1893 = vmatpush3.msra.mxu1 %v1297_v28 }
 0xb82   :  { %1895 = vmatmul.mubr.msk.f32.vlgmr.msra.gmra.mxu1 %vm718_vm1, %v2478_v0  ;;  %1904 = vmatprep.subr.mxu1 %v2090_v29  ;;  %v1450_v0 = vld [vmem:[#allocation7] sm:$0xff] }
 0xb83   :  { %1912 = vmatprep.mubr.msk.f32.mxu1 %vm2092_vm12, %v2090_v29  ;;  %1905 = vmatpush3.msra.mxu1 %v1453_v26 }
 0xb84   :  { %1906 = vmatprep.subr.mxu1 %v2090_v29 }
 0xb85   :  { %1907 = vmatpush3.msra.mxu1 %v1452_v46 }
 0xb86   :  { %1908 = vmatprep.subr.mxu1 %v2090_v29 }
 0xb87   :  { %1909 = vmatpush3.msra.mxu1 %v1451_v47 }
 0xb88   :  { %1910 = vmatprep.subr.mxu1 %v2090_v29 }
 0xb89   :  { %1911 = vmatpush3.msra.mxu1 %v1450_v0 }
 0xbcd   :  { %v1438_v44 = vpop.f32.mrf.mxu0 }
 0xbce   :  { %1444 = vperm.xlu0 %1930, %v1438_v44  }
 0xbcf   :  { %v1903_v45 = vpop.f32.mrf.mxu0 }
 0xc42   :  { %v1368_v48 = vpop.f32.mrf.mxu1 }
 0xc44   :  { %v1896_v49 = vpop.f32.mrf.mxu1 }
 0xc49   :  { %v1445_v50 = vpop.permute.xlu0 %1444 }
 0xc4a   :  { %1948 = vrcp.f32 %v1445_v50 }
 0xc57   :  { %v1949_v51 = vpop.eup %1948 }
 0xc58   :  { %v1448_v52 = vmul.f32 %v1949_v51, %v1368_v48 }
 0xc5a   :  { %v1449_v53 = vadd.f32 %v1448_v52, %v2537_v2 }
 0xc5c   :  { %1913 = vmatmul.mubr.msk.f32.vlgmr.msra.gmra.mxu1 %vm688_vm0, %v1449_v53 }
 0xd1c   :  { %v1523_v54 = vpop.f32.mrf.mxu1 }
 0xd1d   :  { %v1528_v55 = vsel %vm1527_vm2, %v1523_v54, -1e+30 }
 0xd1e   :  { %v1914_v56 = vpop.f32.mrf.mxu1  ;;  %v1529_v57 = vsel %vm607_vm14, %v1528_v55, -inf }
 0xd1f   :  { %1530 = vmax.xlane.f32.xlu1 %v1529_v57 }
 0xda8   :  { %v1531_v29 = vpop.xlane.xlu1 %1530 }
 0xda9   :  { %v1532_v58 = vsub.f32 %v1528_v55, %v1531_v29 }
 0xdab   :  { %v1533_v59 = vmul.f32 1.442695, %v1532_v58 }
 0xdad   :  { %1950 = vpow2.f32 %v1533_v59 }
 0xdba   :  { %v1951_v60 = vpop.eup %1950 }
 0xdbb   :  { %v1535_v61 = vsel %vm607_vm14, %v1951_v60, 0.0 }
 0xdbc   :  { %1536 = vadd.xlane.f32.xlu0 %v1535_v61 }
 0xe45   :  { %v1537_v30 = vpop.xlane.xlu0 %1536 }
 0xe46   :  { %1952 = vlog2.f32 %v1537_v30 }
 0xe53   :  { %v1953_v62 = vpop.eup %1952 }
 0xe54   :  { %v1539_v31 = vmul.f32 0.6931472, %v1953_v62 }
 0xe56   :  { %v1540_v63 = vsub.f32 %v1532_v58, %v1539_v31 }
 0xe58   :  { %1541 = vst [vmem:[#allocation11] sm:$0x3] %v1540_v63 }
 0xe59   :  { %2065 = shalt.err (!%p2062_p1)
}
 0xe5a   :  { %1551 = dma.vmem_to_hbm [thread:$0]  %s1549_s23, 32, %s2594_s10, [#allocation4]  }
 0xe5b   :  { %2080 = dma.done.wait [#allocation4], 32  }
 0xe5c   :  { %2081 = vsyncadd [#allocation4], 4294967264 }
 0xe5d   :  { %1555 = vsyncpa [#allocation3], 1 }
 0xe5e   :  { %1556 = vsyncpa [#allocation6], 1 }
 0xe5f   :  { %1557 = vsyncpa [#allocation9], 1 }
 0xe60   :  { %1558 = vsyncpa [#allocation4], 1 }

</bundles_post_ra>
